<compile_context>
chip_gen: v7x
topology: tpu7x:2x2x1
jax: 0.10.0
libtpu: 0.0.40
codegen_flags: <defaults>
</compile_context>

<pallas_src>
import jax
import jax.numpy as jnp
from jax import lax
from jax.experimental import pallas as pl
from jax.experimental.pallas import tpu as pltpu


def _round_up(x, m):
    return (x + m - 1) // m * m


def _divisor_tile(dim, cap, unit=128):
    """Largest multiple of `unit` that divides `dim` and is <= cap.

    Requires dim % unit == 0.  Guarantees the Pallas path never pads the
    weight matrices.
    """
    q = dim // unit
    best = 1
    for d in range(1, q + 1):
        if q % d == 0 and unit * d <= cap:
            best = d
    return unit * best


def _make_kernel(training, mxu_dtype):
    """Kernel body.  Accumulates directly into the k-resident f32 output
    block: k==0 writes the broadcast bias, every k step adds one NT MXU
    partial product (contraction on in_features; weights stay in their
    stored [out, in] layout, no transpose)."""

    if training:
        def kernel(x_ref, wmu_ref, wsig_ref, weps_ref, b_ref, o_ref):
            @pl.when(pl.program_id(2) == 0)
            def _():
                o_ref[...] = jnp.broadcast_to(
                    b_ref[...].astype(jnp.float32), o_ref.shape)

            # Noise combine stays f32 on the VPU (weights may be stored bf16
            # in HBM); only the MXU operands are cast to mxu_dtype.
            w = (wmu_ref[...].astype(jnp.float32)
                 + wsig_ref[...].astype(jnp.float32)
                 * weps_ref[...].astype(jnp.float32))
            o_ref[...] += lax.dot_general(
                x_ref[...], w.astype(mxu_dtype),
                dimension_numbers=(((1,), (1,)), ((), ())),
                preferred_element_type=jnp.float32)
    else:
        def kernel(x_ref, wmu_ref, b_ref, o_ref):
            @pl.when(pl.program_id(2) == 0)
            def _():
                o_ref[...] = jnp.broadcast_to(
                    b_ref[...].astype(jnp.float32), o_ref.shape)

            o_ref[...] += lax.dot_general(
                x_ref[...], wmu_ref[...].astype(mxu_dtype),
                dimension_numbers=(((1,), (1,)), ((), ())),
                preferred_element_type=jnp.float32)

    return kernel


def noisy_linear(x, weight_mu, weight_sigma, weight_epsilon,
                 bias_mu, bias_sigma, bias_epsilon, *,
                 training=True, mxu_dtype=jnp.bfloat16,
                 block_m=512, block_n=512, block_k=1024):
    """Pallas NoisyLinear forward.

    x:        [B, in_features]            float32 (or bf16)
    weight_*: [out_features, in_features] float32 or bf16 (PyTorch layout)
    bias_*:   [out_features]              float32
    returns:  [B, out_features]           float32
    """
    B, in_f = x.shape
    out_f, in_f2 = weight_mu.shape
    assert in_f == in_f2

    # Bias combine is O(out_f): do it once here, ship one f32 [1, N] row.
    bias = (bias_mu + bias_sigma * bias_epsilon) if training else bias_mu
    bias = bias.astype(jnp.float32).reshape(1, out_f)

    # Tiny / ragged fast path (review): feature dims that are not multiples
    # of 128 would force weight padding, and at DQN-agent scale the Pallas
    # dispatch cost dominates sub-microsecond compute.  Plain XLA there.
    if (in_f % 128 != 0) or (out_f % 128 != 0):
        if training:
            w = (weight_mu.astype(jnp.float32)
                 + weight_sigma.astype(jnp.float32)
                 * weight_epsilon.astype(jnp.float32))
        else:
            w = weight_mu.astype(jnp.float32)
        return jnp.dot(x.astype(jnp.float32), w.T,
                       preferred_element_type=jnp.float32) + bias

    # ---- Pallas path: weights are never padded ----
    n_w = 3 if training else 1
    w_itemsize = jnp.dtype(weight_mu.dtype).itemsize

    bn = _divisor_tile(out_f, max(128, block_n))
    bk = _divisor_tile(in_f, max(128, block_k))

    # One M block whenever possible: every extra M block re-streams the full
    # weight traffic.  Full-extent block is legal even for B % 8 != 0.
    if B <= block_m:
        bm, Mp = B, B
        xp = x
    else:
        bm = max(8, (block_m // 8) * 8)
        Mp = _round_up(B, bm)
        xp = jnp.pad(x, ((0, Mp - B), (0, 0)))
    Mi, Kk = Mp // bm, in_f // bk
    Nj = out_f // bn

    # v7x has 2 TensorCores sharded over the "parallel" grid axes: make sure
    # there are >= 2 parallel blocks whenever the problem allows it.
    if Mi == 1 and Nj == 1 and out_f >= 256:
        bn = _divisor_tile(out_f, out_f // 2)
        Nj = out_f // bn

    # Cast x to the MXU dtype once here (halves x DMA bytes for bf16), not
    # per grid step inside the kernel.
    if xp.dtype != mxu_dtype:
        xp = xp.astype(mxu_dtype)
    x_itemsize = jnp.dtype(xp.dtype).itemsize

    grid = (Mi, Nj, Kk)
    x_spec = pl.BlockSpec((bm, bk), lambda i, j, k: (i, k))
    w_spec = pl.BlockSpec((bn, bk), lambda i, j, k: (j, k))
    b_spec = pl.BlockSpec((1, bn), lambda i, j, k: (0, j))
    o_spec = pl.BlockSpec((bm, bn), lambda i, j, k: (i, j))

    # Scoped VMEM sized from the actual double-buffered tile bytes + headroom
    # (v7x only has 64 MiB / TensorCore, so no fixed 64 MiB claim).
    tile_bytes = (2 * (bm * bk * x_itemsize + n_w * bn * bk * w_itemsize + bn * 4)
                  + 2 * bm * bn * 4)
    vmem_limit = int(min(96 * 1024 * 1024,
                         max(tile_bytes + (4 << 20), 16 * 1024 * 1024)))

    if training:
        in_specs = [x_spec, w_spec, w_spec, w_spec, b_spec]
        args = (xp, weight_mu, weight_sigma, weight_epsilon, bias)
    else:
        in_specs = [x_spec, w_spec, b_spec]
        args = (xp, weight_mu, bias)

    out = pl.pallas_call(
        _make_kernel(training, mxu_dtype),
        out_shape=jax.ShapeDtypeStruct((Mp, out_f), jnp.float32),
        grid_spec=pltpu.PrefetchScalarGridSpec(
            num_scalar_prefetch=0,
            grid=grid,
            in_specs=in_specs,
            out_specs=o_spec),
        compiler_params=pltpu.CompilerParams(
            dimension_semantics=("parallel", "parallel", "arbitrary"),
            vmem_limit_bytes=vmem_limit),
    )(*args)

    return out if Mp == B else out[:B]


def cast_noisy_weights(params, dtype=jnp.bfloat16):
    """Cast the weight tensors to a narrower HBM storage dtype (biases stay
    f32).  Do this ONCE when parameters / noise are (re)set, outside the hot
    forward: bf16 mu/sigma/eps halves the dominant weight HBM traffic."""
    out = dict(params)
    for k in ("weight_mu", "weight_sigma", "weight_epsilon"):
        out[k] = params[k].astype(dtype)
    return out


def init_noisy_linear_params(key, in_features, out_features, sigma_init=0.017):
    """Deterministic re-implementation of NoisyLinear.__init__ param setup."""
    k_wmu, k_bmu, k_weps, k_beps = jax.random.split(key, 4)
    mu_range = 1.0 / jnp.sqrt(jnp.float32(in_features))
    weight_mu = jax.random.uniform(
        k_wmu, (out_features, in_features), jnp.float32, -mu_range, mu_range)
    bias_mu = jax.random.uniform(
        k_bmu, (out_features,), jnp.float32, -mu_range, mu_range)
    weight_sigma = jnp.full((out_features, in_features), sigma_init, jnp.float32)
    bias_sigma = jnp.full((out_features,), sigma_init, jnp.float32)
    # reset_noise(): independent standard-normal epsilon buffers
    weight_epsilon = jax.random.normal(k_weps, (out_features, in_features), jnp.float32)
    bias_epsilon = jax.random.normal(k_beps, (out_features,), jnp.float32)
    return dict(weight_mu=weight_mu, weight_sigma=weight_sigma,
                weight_epsilon=weight_epsilon, bias_mu=bias_mu,
                bias_sigma=bias_sigma, bias_epsilon=bias_epsilon)


if __name__ == "__main__":
    key = jax.random.PRNGKey(0)
    k1, kx1, k2, kx2, k3, kx3 = jax.random.split(key, 6)

    def reference(x, p, training):
        if training:
            w = p["weight_mu"] + p["weight_sigma"] * p["weight_epsilon"]
            b = p["bias_mu"] + p["bias_sigma"] * p["bias_epsilon"]
        else:
            w, b = p["weight_mu"], p["bias_mu"]
        return jnp.dot(x, w.T, precision=lax.Precision.HIGHEST) + b

    # ---- Pallas path: DQN hidden-layer scale (128-multiple features) ----
    B, IN_F, OUT_F = 32, 256, 128
    p = init_noisy_linear_params(k1, IN_F, OUT_F)
    x = jax.random.normal(kx1, (B, IN_F), jnp.float32)

    y_f32 = jax.block_until_ready(
        noisy_linear(x, **p, training=True, mxu_dtype=jnp.float32))
    y_bf16 = jax.block_until_ready(noisy_linear(x, **p, training=True))
    y_eval = jax.block_until_ready(
        noisy_linear(x, **p, training=False, mxu_dtype=jnp.float32))

    ref_t = reference(x, p, True)
    ref_e = reference(x, p, False)
    assert y_f32.shape == (B, OUT_F) and y_f32.dtype == jnp.float32
    assert jnp.allclose(y_f32, ref_t, atol=1e-3, rtol=1e-3)
    assert jnp.allclose(y_bf16, ref_t, atol=5e-2, rtol=5e-2)
    assert jnp.allclose(y_eval, ref_e, atol=1e-3, rtol=1e-3)

    # bf16-stored weights (cast once, outside the hot path) + bf16 MXU.
    p_bf = cast_noisy_weights(p, jnp.bfloat16)
    y_store = jax.block_until_ready(noisy_linear(x, **p_bf, training=True))
    assert jnp.allclose(y_store, ref_t, atol=5e-2, rtol=5e-2)

    # ---- Exercise the k-accumulation grid and the 2-TensorCore N split ----
    B2, IN2, OUT2 = 64, 512, 512
    p2 = init_noisy_linear_params(k2, IN2, OUT2)
    x2 = jax.random.normal(kx2, (B2, IN2), jnp.float32)
    y2 = jax.block_until_ready(
        noisy_linear(x2, **p2, training=True, mxu_dtype=jnp.float32, block_k=128))
    assert jnp.allclose(y2, reference(x2, p2, True), atol=1e-3, rtol=1e-3)

    # ---- Tiny DQN-agent shape: XLA fast path (no padding, no dispatch) ----
    B3, IN3, OUT3 = 8, 32, 16
    p3 = init_noisy_linear_params(k3, IN3, OUT3)
    x3 = jax.random.normal(kx3, (B3, IN3), jnp.float32)
    y3 = jax.block_until_ready(noisy_linear(x3, **p3, training=True))
    assert y3.shape == (B3, OUT3)
    assert jnp.allclose(y3, reference(x3, p3, True), atol=2e-2, rtol=2e-2)

    print("KERNEL_OK")
</pallas_src>

<mosaic_0001>
module attributes {stable_mosaic.version = 11 : i64} {
  func.func @kernel(%arg0: i32, %arg1: i32, %arg2: i32, %arg3: memref<32x256xf32, #tpu.memory_space<vmem>>, %arg4: memref<128x256xf32, #tpu.memory_space<vmem>>, %arg5: memref<128x256xf32, #tpu.memory_space<vmem>>, %arg6: memref<128x256xf32, #tpu.memory_space<vmem>>, %arg7: memref<1x128xf32, #tpu.memory_space<vmem>>, %arg8: memref<32x128xf32, #tpu.memory_space<vmem>>) attributes {dimension_semantics = [#tpu.dimension_semantics<parallel>, #tpu.dimension_semantics<parallel>, #tpu.dimension_semantics<arbitrary>], iteration_bounds = array<i64: 1, 1, 1>, scalar_prefetch = 0 : i64, scratch_operands = 0 : i64, tpu.core_type = #tpu.core_type<tc>, window_params = [{transform_indices = @transform_0, window_bounds = array<i64: 32, 256>}, {transform_indices = @transform_1, window_bounds = array<i64: 128, 256>}, {transform_indices = @transform_2, window_bounds = array<i64: 128, 256>}, {transform_indices = @transform_3, window_bounds = array<i64: 128, 256>}, {transform_indices = @transform_4, window_bounds = array<i64: 1, 128>}, {transform_indices = @transform_5, window_bounds = array<i64: 32, 128>}]} {
    %c0_i32 = arith.constant 0 : i32
    %0 = arith.cmpi eq, %arg2, %c0_i32 : i32
    %1 = arith.extui %0 : i1 to i32
    %c0_i32_0 = arith.constant 0 : i32
    %2 = arith.cmpi ne, %1, %c0_i32_0 : i32
    scf.if %2 {
      %c0_12 = arith.constant 0 : index
      %c0_13 = arith.constant 0 : index
      %13 = vector.load %arg7[%c0_12, %c0_13] : memref<1x128xf32, #tpu.memory_space<vmem>>, vector<1x128xf32>
      %14 = vector.shape_cast %13 : vector<1x128xf32> to vector<1x128xf32>
      %15 = vector.broadcast %14 : vector<1x128xf32> to vector<32x128xf32>
      %c0_14 = arith.constant 0 : index
      %c0_15 = arith.constant 0 : index
      %16 = vector.load %arg8[%c0_14, %c0_15] : memref<32x128xf32, #tpu.memory_space<vmem>>, vector<32x128xf32>
      tpu.vector_store %arg8[%c0_14, %c0_15], %15 {strides = array<i32>} : memref<32x128xf32, #tpu.memory_space<vmem>>, vector<32x128xf32>,
    } else {
    }
    %c0 = arith.constant 0 : index
    %c0_1 = arith.constant 0 : index
    %3 = vector.load %arg4[%c0, %c0_1] : memref<128x256xf32, #tpu.memory_space<vmem>>, vector<128x256xf32>
    %c0_2 = arith.constant 0 : index
    %c0_3 = arith.constant 0 : index
    %4 = vector.load %arg5[%c0_2, %c0_3] : memref<128x256xf32, #tpu.memory_space<vmem>>, vector<128x256xf32>
    %c0_4 = arith.constant 0 : index
    %c0_5 = arith.constant 0 : index
    %5 = vector.load %arg6[%c0_4, %c0_5] : memref<128x256xf32, #tpu.memory_space<vmem>>, vector<128x256xf32>
    %6 = arith.mulf %4, %5 : vector<128x256xf32>
    %7 = arith.addf %3, %6 : vector<128x256xf32>
    %c0_6 = arith.constant 0 : index
    %c0_7 = arith.constant 0 : index
    %8 = vector.load %arg8[%c0_6, %c0_7] : memref<32x128xf32, #tpu.memory_space<vmem>>, vector<32x128xf32>
    %c0_8 = arith.constant 0 : index
    %c0_9 = arith.constant 0 : index
    %9 = vector.load %arg3[%c0_8, %c0_9] : memref<32x256xf32, #tpu.memory_space<vmem>>, vector<32x256xf32>
    %cst = arith.constant dense<0.000000e+00> : vector<32x128xf32>
    %10 = tpu.matmul %9, %7, %cst {dimension_numbers = #tpu.dot_dimension_numbers<[1], [1], [0], [0], [0, 0, 1, 0], [], []>} : vector<32x256xf32>, vector<128x256xf32>, vector<32x128xf32> -> vector<32x128xf32>
    %11 = arith.addf %8, %10 : vector<32x128xf32>
    %c0_10 = arith.constant 0 : index
    %c0_11 = arith.constant 0 : index
    %12 = vector.load %arg8[%c0_10, %c0_11] : memref<32x128xf32, #tpu.memory_space<vmem>>, vector<32x128xf32>
    tpu.vector_store %arg8[%c0_10, %c0_11], %11 {strides = array<i32>} : memref<32x128xf32, #tpu.memory_space<vmem>>, vector<32x128xf32>,
    return
  }
  func.func @transform_0(%arg0: i32, %arg1: i32, %arg2: i32) -> (i32, i32) {
    %c0_i32 = arith.constant 0 : i32
    return %arg0, %arg2 : i32, i32
  }
  func.func @transform_1(%arg0: i32, %arg1: i32, %arg2: i32) -> (i32, i32) {
    %c0_i32 = arith.constant 0 : i32
    return %arg1, %arg2 : i32, i32
  }
  func.func @transform_2(%arg0: i32, %arg1: i32, %arg2: i32) -> (i32, i32) {
    %c0_i32 = arith.constant 0 : i32
    return %arg1, %arg2 : i32, i32
  }
  func.func @transform_3(%arg0: i32, %arg1: i32, %arg2: i32) -> (i32, i32) {
    %c0_i32 = arith.constant 0 : i32
    return %arg1, %arg2 : i32, i32
  }
  func.func @transform_4(%arg0: i32, %arg1: i32, %arg2: i32) -> (i32, i32) {
    %c0_i32 = arith.constant 0 : i32
    %c0_i32_0 = arith.constant 0 : i32
    return %c0_i32, %arg1 : i32, i32
  }
  func.func @transform_5(%arg0: i32, %arg1: i32, %arg2: i32) -> (i32, i32) {
    %c0_i32 = arith.constant 0 : i32
    return %arg0, %arg1 : i32, i32
  }
}

</mosaic_0001>

<bundles_post_ra>
// kernel: tpu_custom_call.1
= control target key start
LH: loop header
LB: loop body
LE: loop exit
PB: predicated region body
PF: predicated region fallthrough
CT: control target
= control target key end

     0   :  { %10 = vsyncpa [#allocation3], 0  ;;  %s679_s0 = inlined_call_operand.hbm [shape: f32[32,256], index: 0, kind: input, shape index: {}]   ;;  %s680_s1 = inlined_call_operand.hbm [shape: f32[128,256], index: 1, kind: input, shape index: {}]   ;;  %s681_s2 = inlined_call_operand.hbm [shape: f32[128,256], index: 2, kind: input, shape index: {}]   ;;  %s682_s3 = inlined_call_operand.hbm [shape: f32[128,256], index: 3, kind: input, shape index: {}]   ;;  %s683_s4 = inlined_call_operand.vmem [shape: f32[1,128], index: 4, kind: input, shape index: {}]   ;;  %s684_s5 = inlined_call_operand.hbm [shape: f32[32,128], index: 5, kind: output, shape index: {}]  }
   0x1   :  { %11 = vsyncpa [#allocation6], 0 }
   0x2   :  { %12 = vsyncpa [#allocation9], 0 }
   0x3   :  { %13 = vsyncpa [#allocation4], 0  ;;  %s551_s18 = smov [#allocation5]   ;;  %s552_s20 = smov [#allocation2]  }
   0x4   :  { %s31_s19 = sshll.u32 %s551_s18, 4  ;;  %s19_s21 = sshll.u32 %s552_s20, 4  ;;  %s32_s19 = int_to_ptr.vmem [resolvable:$true] %s31_s19  ;;  %s590_s21 = int_to_ptr.vmem [resolvable:$true] %s19_s21 }
   0x5   :  { %s433_s24 = scalar_lea.hbm %s680_s1, 4096 }
   0x6   :  { %p434_p0 = scmp.ne.s32.totalorder %s680_s1, %s433_s24  ;;  %p437_p1 = scmp.lt.u32.totalorder %s433_s24, %s680_s1 }
   0x8   :  { %p439_p2 = pnand %p437_p1, %p434_p0 }
   0xa   :  { %442 = shalt.err (!%p439_p2)
}
   0xb   :  { %s443_s29 = scalar_lea.vmem %s32_s19, 4096  ;;  %p448_p4 = scmp.lt.s32.totalorder %s32_s19, %s32_s19 }
   0xc   :  { %p444_p3 = scmp.ne.s32.totalorder %s32_s19, %s443_s29  ;;  %p449_p5 = scmp.lt.s32.totalorder %s443_s29, %s443_s29 }
   0xe   :  { %p450_p6 = por %p449_p5, %p448_p4 }
  0x10   :  { %p451_p7 = pnand %p450_p6, %p444_p3 }
  0x12   :  { %454 = shalt.err (!%p451_p7)
}
  0x13   :  { %s553_s30 = smov 256   ;;  %s554_s6 = smov 16  }
  0x14   :  { %37 = dma.hbm_to_vmem [thread:$0]  %s680_s1, 4096, %s32_s19, [#allocation6], %s553_s30, %s553_s30, %s554_s6  }
  0x15   :  { %s455_s11 = scalar_lea.hbm %s679_s0, 1024 }
  0x16   :  { %p456_p8 = scmp.ne.s32.totalorder %s679_s0, %s455_s11  ;;  %p459_p9 = scmp.lt.u32.totalorder %s455_s11, %s679_s0 }
  0x18   :  { %p461_p10 = pnand %p459_p9, %p456_p8 }
  0x1a   :  { %464 = shalt.err (!%p461_p10)
}
  0x1b   :  { %s465_s16 = scalar_lea.vmem %s590_s21, 1024  ;;  %p470_p12 = scmp.lt.s32.totalorder %s590_s21, %s590_s21 }
  0x1c   :  { %p466_p11 = scmp.ne.s32.totalorder %s590_s21, %s465_s16  ;;  %p471_p13 = scmp.lt.s32.totalorder %s465_s16, %s465_s16 }
  0x1e   :  { %p472_p0 = por %p471_p13, %p470_p12 }
  0x20   :  { %p473_p1 = pnand %p472_p0, %p466_p11 }
  0x22   :  { %476 = shalt.err (!%p473_p1)
}
  0x23   :  { %25 = dma.hbm_to_vmem [thread:$0]  %s679_s0, 1024, %s590_s21, [#allocation3], %s553_s30, %s553_s30, %s554_s6  }
  0x24   :  { %s555_s18 = smov [#allocation7]   ;;  %s556_s20 = smov [#allocation8]  }
  0x25   :  { %s43_s19 = sshll.u32 %s555_s18, 4  ;;  %s55_s22 = sshll.u32 %s556_s20, 4  ;;  %s44_s19 = int_to_ptr.vmem [resolvable:$true] %s43_s19  ;;  %s627_s22 = int_to_ptr.vmem [resolvable:$true] %s55_s22 }
  0x26   :  { %s477_s25 = scalar_lea.hbm %s681_s2, 4096 }
  0x27   :  { %p478_p2 = scmp.ne.s32.totalorder %s681_s2, %s477_s25  ;;  %p481_p3 = scmp.lt.u32.totalorder %s477_s25, %s681_s2 }
  0x29   :  { %p483_p4 = pnand %p481_p3, %p478_p2 }
  0x2b   :  { %486 = shalt.err (!%p483_p4)
}
  0x2c   :  { %s487_s0 = scalar_lea.vmem %s44_s19, 4096  ;;  %p492_p6 = scmp.lt.s32.totalorder %s44_s19, %s44_s19 }
  0x2d   :  { %p488_p5 = scmp.ne.s32.totalorder %s44_s19, %s487_s0  ;;  %p493_p7 = scmp.lt.s32.totalorder %s487_s0, %s487_s0 }
  0x2f   :  { %p494_p8 = por %p493_p7, %p492_p6 }
  0x31   :  { %p495_p9 = pnand %p494_p8, %p488_p5 }
  0x33   :  { %498 = shalt.err (!%p495_p9)
}
  0x34   :  { %49 = dma.hbm_to_vmem [thread:$0]  %s681_s2, 4096, %s44_s19, [#allocation6], %s553_s30, %s553_s30, %s554_s6  }
  0x35   :  { %s499_s10 = scalar_lea.hbm %s682_s3, 4096 }
  0x36   :  { %p500_p10 = scmp.ne.s32.totalorder %s682_s3, %s499_s10  ;;  %p503_p11 = scmp.lt.u32.totalorder %s499_s10, %s682_s3 }
  0x38   :  { %p505_p12 = pnand %p503_p11, %p500_p10 }
  0x3a   :  { %508 = shalt.err (!%p505_p12)
}
  0x3b   :  { %s509_s15 = scalar_lea.vmem %s627_s22, 4096  ;;  %p514_p0 = scmp.lt.s32.totalorder %s627_s22, %s627_s22 }
  0x3c   :  { %p510_p13 = scmp.ne.s32.totalorder %s627_s22, %s509_s15  ;;  %p515_p1 = scmp.lt.s32.totalorder %s509_s15, %s509_s15 }
  0x3e   :  { %p516_p2 = por %p515_p1, %p514_p0 }
  0x40   :  { %p517_p3 = pnand %p516_p2, %p510_p13 }
  0x42   :  { %520 = shalt.err (!%p517_p3)
}
  0x43   :  { %61 = dma.hbm_to_vmem [thread:$0]  %s682_s3, 4096, %s627_s22, [#allocation9], %s553_s30, %s553_s30, %s554_s6  }
  0x44   :  { %543 = dma.done.wait [#allocation3], 1024  }
  0x45   :  { %544 = vsyncadd [#allocation3], 4294966272 }
  0x46   :  { %545 = dma.done.wait [#allocation6], 8192  }
  0x47   :  { %546 = vsyncadd [#allocation6], 4294959104 }
  0x48   :  { %547 = dma.done.wait [#allocation9], 4096  }
  0x49   :  { %548 = vsyncadd [#allocation9], 4294963200  ;;  %v92_v0 = vld [vmem:[#allocation5 + $0x8] sm:$0xff]  ;;  %v94_v1 = vld [vmem:[#allocation5 + $0x18] sm:$0xff]  ;;  %s557_s6 = smov [#allocation10]  }
  0x4a   :  { %v124_v2 = vld [vmem:[#allocation7 + $0x8] sm:$0xff]  ;;  %v126_v3 = vld [vmem:[#allocation7 + $0x18] sm:$0xff]  ;;  %v91_v8 = vld [vmem:[#allocation5] sm:$0xff]  ;;  %s361_s1 = sshll.u32 %s557_s6, 4  ;;  %s362_s1 = int_to_ptr.vmem [resolvable:$true] %s361_s1 }
  0x4b   :  { %v156_v4 = vld [vmem:[#allocation8 + $0x8] sm:$0xff]  ;;  %v158_v5 = vld [vmem:[#allocation8 + $0x18] sm:$0xff]  ;;  %v93_v9 = vld [vmem:[#allocation5 + $0x10] sm:$0xff]  ;;  %p526_p5 = scmp.lt.s32.totalorder %s362_s1, %s362_s1 }
  0x4c   :  { %v188_v6 = vmul.f32 %v156_v4, %v124_v2  ;;  %v190_v7 = vmul.f32 %v158_v5, %v126_v3  ;;  %v123_v10 = vld [vmem:[#allocation7] sm:$0xff]  ;;  %v125_v11 = vld [vmem:[#allocation7 + $0x10] sm:$0xff]  ;;  %v96_v18 = vld [vmem:[#allocation5 + $0x28] sm:$0xff] }
  0x4d   :  { %v155_v12 = vld [vmem:[#allocation8] sm:$0xff]  ;;  %v157_v13 = vld [vmem:[#allocation8 + $0x10] sm:$0xff]  ;;  %v98_v19 = vld [vmem:[#allocation5 + $0x38] sm:$0xff] }
  0x4e   :  { %v220_v14 = vadd.f32 %v188_v6, %v92_v0  ;;  %v222_v15 = vadd.f32 %v190_v7, %v94_v1  ;;  %v187_v16 = vmul.f32 %v155_v12, %v123_v10  ;;  %v189_v17 = vmul.f32 %v157_v13, %v125_v11  ;;  %v128_v20 = vld [vmem:[#allocation7 + $0x28] sm:$0xff]  ;;  %v130_v21 = vld [vmem:[#allocation7 + $0x38] sm:$0xff]  ;;  %v95_v28 = vld [vmem:[#allocation5 + $0x20] sm:$0xff] }
  0x4f   :  { %v160_v22 = vld [vmem:[#allocation8 + $0x28] sm:$0xff]  ;;  %v162_v23 = vld [vmem:[#allocation8 + $0x38] sm:$0xff]  ;;  %v97_v29 = vld [vmem:[#allocation5 + $0x30] sm:$0xff] }
  0x50   :  { %v376_v24 = vpack.c.bf16 %v222_v15, %v220_v14  ;;  %v219_v25 = vadd.f32 %v187_v16, %v91_v8  ;;  %v221_v26 = vadd.f32 %v189_v17, %v93_v9  ;;  %v192_v27 = vmul.f32 %v160_v22, %v128_v20  ;;  %v127_v30 = vld [vmem:[#allocation7 + $0x20] sm:$0xff]  ;;  %v129_v32 = vld [vmem:[#allocation7 + $0x30] sm:$0xff]  ;;  %v100_v38 = vld [vmem:[#allocation5 + $0x48] sm:$0xff] }
  0x51   :  { %v194_v31 = vmul.f32 %v162_v23, %v130_v21  ;;  %v159_v33 = vld [vmem:[#allocation8 + $0x20] sm:$0xff]  ;;  %v161_v34 = vld [vmem:[#allocation8 + $0x30] sm:$0xff]  ;;  %v102_v39 = vld [vmem:[#allocation5 + $0x58] sm:$0xff] }
  0x52   :  { %377 = vmatprep.subr.bf16.mxu0 %v376_v24  ;;  %408 = vmatprep.subr.bf16.mxu1 %v376_v24  ;;  %v378_v35 = vpack.c.bf16 %v221_v26, %v219_v25  ;;  %v224_v36 = vadd.f32 %v192_v27, %v96_v18  ;;  %v191_v37 = vmul.f32 %v159_v33, %v127_v30  ;;  %v132_v40 = vld [vmem:[#allocation7 + $0x48] sm:$0xff]  ;;  %v134_v43 = vld [vmem:[#allocation7 + $0x58] sm:$0xff]  ;;  %v131_v49 = vld [vmem:[#allocation7 + $0x40] sm:$0xff] }
  0x53   :  { %v226_v41 = vadd.f32 %v194_v31, %v98_v19  ;;  %v193_v42 = vmul.f32 %v161_v34, %v129_v32  ;;  %v164_v44 = vld [vmem:[#allocation8 + $0x48] sm:$0xff]  ;;  %v166_v45 = vld [vmem:[#allocation8 + $0x58] sm:$0xff]  ;;  %v133_v52 = vld [vmem:[#allocation7 + $0x50] sm:$0xff] }
  0x54   :  { %379 = vmatpush1.bf16.xpose.msra.mxu0 %v378_v35  ;;  %416 = vmatpush1.bf16.xpose.msra.mxu1 %v378_v35  ;;  %v223_v46 = vadd.f32 %v191_v37, %v95_v28  ;;  %v196_v47 = vmul.f32 %v164_v44, %v132_v40  ;;  %v198_v48 = vmul.f32 %v166_v45, %v134_v43  ;;  %v163_v53 = vld [vmem:[#allocation8 + $0x40] sm:$0xff]  ;;  %v165_v54 = vld [vmem:[#allocation8 + $0x50] sm:$0xff]  ;;  %v136_v57 = vld [vmem:[#allocation7 + $0x68] sm:$0xff] }
  0x55   :  { %v380_v50 = vpack.c.bf16 %v226_v41, %v224_v36  ;;  %v225_v51 = vadd.f32 %v193_v42, %v97_v29  ;;  %v138_v58 = vld [vmem:[#allocation7 + $0x78] sm:$0xff]  ;;  %v168_v59 = vld [vmem:[#allocation8 + $0x68] sm:$0xff]  ;;  %v195_v62 = vmul.f32 %v163_v53, %v131_v49  ;;  %v197_v63 = vmul.f32 %v165_v54, %v133_v52  ;;  %v99_v1 = vld [vmem:[#allocation5 + $0x40] sm:$0xff] }
  0x56   :  { %v228_v55 = vadd.f32 %v196_v47, %v100_v38  ;;  %v230_v56 = vadd.f32 %v198_v48, %v102_v39  ;;  %v170_v60 = vld [vmem:[#allocation8 + $0x78] sm:$0xff]  ;;  %v101_v2 = vld [vmem:[#allocation5 + $0x50] sm:$0xff]  ;;  %v200_v3 = vmul.f32 %v168_v59, %v136_v57  ;;  %v104_v5 = vld [vmem:[#allocation5 + $0x68] sm:$0xff] }
  0x57   :  { %381 = vmatprep.subr.bf16.mxu0 %v380_v50  ;;  %409 = vmatprep.subr.bf16.mxu1 %v380_v50  ;;  %v382_v61 = vpack.c.bf16 %v225_v51, %v223_v46  ;;  %v202_v4 = vmul.f32 %v170_v60, %v138_v58  ;;  %v106_v6 = vld [vmem:[#allocation5 + $0x78] sm:$0xff]  ;;  %v227_v7 = vadd.f32 %v195_v62, %v99_v1  ;;  %v135_v9 = vld [vmem:[#allocation7 + $0x60] sm:$0xff]  ;;  %v137_v10 = vld [vmem:[#allocation7 + $0x70] sm:$0xff] }
  0x58   :  { %v384_v0 = vpack.c.bf16 %v230_v56, %v228_v55  ;;  %v229_v8 = vadd.f32 %v197_v63, %v101_v2  ;;  %v232_v11 = vadd.f32 %v200_v3, %v104_v5  ;;  %v167_v13 = vld [vmem:[#allocation8 + $0x60] sm:$0xff]  ;;  %v169_v14 = vld [vmem:[#allocation8 + $0x70] sm:$0xff]  ;;  %v140_v15 = vld [vmem:[#allocation7 + $0x88] sm:$0xff] }
  0x59   :  { %v234_v12 = vadd.f32 %v202_v4, %v106_v6  ;;  %v142_v16 = vld [vmem:[#allocation7 + $0x98] sm:$0xff]  ;;  %v172_v17 = vld [vmem:[#allocation8 + $0x88] sm:$0xff]  ;;  %v199_v20 = vmul.f32 %v167_v13, %v135_v9  ;;  %v201_v21 = vmul.f32 %v169_v14, %v137_v10  ;;  %v103_v23 = vld [vmem:[#allocation5 + $0x60] sm:$0xff] }
  0x5a   :  { %v174_v18 = vld [vmem:[#allocation8 + $0x98] sm:$0xff]  ;;  %v386_v19 = vpack.c.bf16 %v229_v8, %v227_v7  ;;  %v105_v24 = vld [vmem:[#allocation5 + $0x70] sm:$0xff]  ;;  %v204_v25 = vmul.f32 %v172_v17, %v140_v15  ;;  %v108_v27 = vld [vmem:[#allocation5 + $0x88] sm:$0xff] }
  0x5b   :  { %v388_v22 = vpack.c.bf16 %v234_v12, %v232_v11  ;;  %v206_v26 = vmul.f32 %v174_v18, %v142_v16  ;;  %v110_v28 = vld [vmem:[#allocation5 + $0x98] sm:$0xff]  ;;  %v231_v29 = vadd.f32 %v199_v20, %v103_v23  ;;  %v233_v30 = vadd.f32 %v201_v21, %v105_v24  ;;  %v139_v31 = vld [vmem:[#allocation7 + $0x80] sm:$0xff]  ;;  %v141_v32 = vld [vmem:[#allocation7 + $0x90] sm:$0xff] }
  0x5c   :  { %383 = vmatpush1.bf16.xpose.msra.mxu0 %v382_v61  ;;  %417 = vmatpush1.bf16.xpose.msra.mxu1 %v382_v61  ;;  %v236_v33 = vadd.f32 %v204_v25, %v108_v27  ;;  %v171_v35 = vld [vmem:[#allocation8 + $0x80] sm:$0xff]  ;;  %v173_v36 = vld [vmem:[#allocation8 + $0x90] sm:$0xff]  ;;  %v144_v37 = vld [vmem:[#allocation7 + $0xa8] sm:$0xff] }
  0x5d   :  { %385 = vmatprep.subr.bf16.mxu0 %v384_v0  ;;  %410 = vmatprep.subr.bf16.mxu1 %v384_v0  ;;  %v238_v34 = vadd.f32 %v206_v26, %v110_v28  ;;  %v146_v38 = vld [vmem:[#allocation7 + $0xb8] sm:$0xff]  ;;  %v176_v39 = vld [vmem:[#allocation8 + $0xa8] sm:$0xff]  ;;  %v390_v41 = vpack.c.bf16 %v233_v30, %v231_v29  ;;  %v203_v42 = vmul.f32 %v171_v35, %v139_v31  ;;  %v107_v45 = vld [vmem:[#allocation5 + $0x80] sm:$0xff] }
  0x5e   :  { %v178_v40 = vld [vmem:[#allocation8 + $0xb8] sm:$0xff]  ;;  %v205_v43 = vmul.f32 %v173_v36, %v141_v32  ;;  %v109_v46 = vld [vmem:[#allocation5 + $0x90] sm:$0xff]  ;;  %v112_v47 = vld [vmem:[#allocation5 + $0xa8] sm:$0xff]  ;;  %v208_v48 = vmul.f32 %v176_v39, %v144_v37 }
  0x5f   :  { %v392_v44 = vpack.c.bf16 %v238_v34, %v236_v33  ;;  %v210_v49 = vmul.f32 %v178_v40, %v146_v38  ;;  %v114_v50 = vld [vmem:[#allocation5 + $0xb8] sm:$0xff]  ;;  %v256_v51 = vld [vmem:[#allocation2 + $0x8] sm:$0xff]  ;;  %v235_v53 = vadd.f32 %v203_v42, %v107_v45  ;;  %v143_v55 = vld [vmem:[#allocation7 + $0xa0] sm:$0xff] }
  0x60   :  { %v260_v52 = vld [vmem:[#allocation2 + $0x28] sm:$0xff]  ;;  %327 = vmatprep.mubr.f32.mxu0 %v256_v51  ;;  %v237_v54 = vadd.f32 %v205_v43, %v109_v46  ;;  %v145_v56 = vld [vmem:[#allocation7 + $0xb0] sm:$0xff]  ;;  %v240_v57 = vadd.f32 %v208_v48, %v112_v47  ;;  %v175_v59 = vld [vmem:[#allocation8 + $0xa0] sm:$0xff] }
  0x61   :  { %337 = vmatprep.mubr.f32.mxu1 %v260_v52  ;;  %v242_v58 = vadd.f32 %v210_v49, %v114_v50  ;;  %v177_v60 = vld [vmem:[#allocation8 + $0xb0] sm:$0xff]  ;;  %v148_v61 = vld [vmem:[#allocation7 + $0xc8] sm:$0xff]  ;;  %v150_v62 = vld [vmem:[#allocation7 + $0xd8] sm:$0xff]  ;;  %v207_v2 = vmul.f32 %v175_v59, %v143_v55 }
  0x62   :  { %v180_v63 = vld [vmem:[#allocation8 + $0xc8] sm:$0xff]  ;;  %v182_v0 = vld [vmem:[#allocation8 + $0xd8] sm:$0xff]  ;;  %v394_v1 = vpack.c.bf16 %v237_v54, %v235_v53  ;;  %v209_v3 = vmul.f32 %v177_v60, %v145_v56  ;;  %v111_v5 = vld [vmem:[#allocation5 + $0xa0] sm:$0xff] }
  0x63   :  { %v396_v4 = vpack.c.bf16 %v242_v58, %v240_v57  ;;  %v113_v6 = vld [vmem:[#allocation5 + $0xb0] sm:$0xff]  ;;  %v212_v7 = vmul.f32 %v180_v63, %v148_v61  ;;  %v214_v8 = vmul.f32 %v182_v0, %v150_v62  ;;  %v116_v9 = vld [vmem:[#allocation5 + $0xc8] sm:$0xff]  ;;  %v118_v10 = vld [vmem:[#allocation5 + $0xd8] sm:$0xff]  ;;  %v239_v11 = vadd.f32 %v207_v2, %v111_v5 }
  0x64   :  { %387 = vmatpush1.bf16.xpose.msra.mxu0 %v386_v19  ;;  %418 = vmatpush1.bf16.xpose.msra.mxu1 %v386_v19  ;;  %v241_v12 = vadd.f32 %v209_v3, %v113_v6  ;;  %v147_v13 = vld [vmem:[#allocation7 + $0xc0] sm:$0xff]  ;;  %v149_v14 = vld [vmem:[#allocation7 + $0xd0] sm:$0xff]  ;;  %v152_v19 = vld [vmem:[#allocation7 + $0xe8] sm:$0xff] }
  0x65   :  { %389 = vmatprep.subr.bf16.mxu0 %v388_v22  ;;  %411 = vmatprep.subr.bf16.mxu1 %v388_v22  ;;  %v244_v15 = vadd.f32 %v212_v7, %v116_v9  ;;  %v246_v16 = vadd.f32 %v214_v8, %v118_v10  ;;  %v179_v17 = vld [vmem:[#allocation8 + $0xc0] sm:$0xff]  ;;  %v181_v18 = vld [vmem:[#allocation8 + $0xd0] sm:$0xff]  ;;  %v154_v20 = vld [vmem:[#allocation7 + $0xf8] sm:$0xff] }
  0x66   :  { %v184_v21 = vld [vmem:[#allocation8 + $0xe8] sm:$0xff]  ;;  %v186_v22 = vld [vmem:[#allocation8 + $0xf8] sm:$0xff]  ;;  %v398_v23 = vpack.c.bf16 %v241_v12, %v239_v11  ;;  %v211_v24 = vmul.f32 %v179_v17, %v147_v13  ;;  %v213_v25 = vmul.f32 %v181_v18, %v149_v14  ;;  %v115_v27 = vld [vmem:[#allocation5 + $0xc0] sm:$0xff] }
  0x67   :  { %v400_v26 = vpack.c.bf16 %v246_v16, %v244_v15  ;;  %v117_v28 = vld [vmem:[#allocation5 + $0xd0] sm:$0xff]  ;;  %v216_v29 = vmul.f32 %v184_v21, %v152_v19  ;;  %v218_v30 = vmul.f32 %v186_v22, %v154_v20  ;;  %v120_v31 = vld [vmem:[#allocation5 + $0xe8] sm:$0xff]  ;;  %v122_v32 = vld [vmem:[#allocation5 + $0xf8] sm:$0xff] }
  0x68   :  { %v243_v33 = vadd.f32 %v211_v24, %v115_v27  ;;  %v245_v34 = vadd.f32 %v213_v25, %v117_v28  ;;  %v151_v35 = vld [vmem:[#allocation7 + $0xe0] sm:$0xff]  ;;  %v153_v38 = vld [vmem:[#allocation7 + $0xf0] sm:$0xff]  ;;  %v258_v52 = vld [vmem:[#allocation2 + $0x18] sm:$0xff] }
  0x69   :  { %v248_v36 = vadd.f32 %v216_v29, %v120_v31  ;;  %v250_v37 = vadd.f32 %v218_v30, %v122_v32  ;;  %v183_v39 = vld [vmem:[#allocation8 + $0xe0] sm:$0xff]  ;;  %v185_v40 = vld [vmem:[#allocation8 + $0xf0] sm:$0xff]  ;;  %v262_v53 = vld [vmem:[#allocation2 + $0x38] sm:$0xff] }
  0x6a   :  { %v215_v42 = vmul.f32 %v183_v39, %v151_v35  ;;  %v217_v43 = vmul.f32 %v185_v40, %v153_v38  ;;  %v119_v45 = vld [vmem:[#allocation5 + $0xe0] sm:$0xff]  ;;  %v121_v46 = vld [vmem:[#allocation5 + $0xf0] sm:$0xff] }
  0x6b   :  { %v255_v50 = vld [vmem:[#allocation2] sm:$0xff]  ;;  %v257_v54 = vld [vmem:[#allocation2 + $0x10] sm:$0xff] }
  0x6c   :  { %391 = vmatpush1.bf16.xpose.msra.mxu0 %v390_v41  ;;  %419 = vmatpush1.bf16.xpose.msra.mxu1 %v390_v41  ;;  %v402_v41 = vpack.c.bf16 %v245_v34, %v243_v33  ;;  %v247_v47 = vadd.f32 %v215_v42, %v119_v45  ;;  %v249_v48 = vadd.f32 %v217_v43, %v121_v46  ;;  %v259_v51 = vld [vmem:[#allocation2 + $0x20] sm:$0xff]  ;;  %v261_v55 = vld [vmem:[#allocation2 + $0x30] sm:$0xff] }
  0x6d   :  { %393 = vmatprep.subr.bf16.mxu0 %v392_v44  ;;  %412 = vmatprep.subr.bf16.mxu1 %v392_v44  ;;  %v404_v44 = vpack.c.bf16 %v250_v37, %v248_v36  ;;  %v375_v56 = vld [vmem:[%s683_s4] ss:$0 sm:$0xff]  ;;  %s521_s4 = scalar_lea.vmem %s362_s1, 512 }
  0x6e   :  { %v406_v49 = vpack.c.bf16 %v249_v48, %v247_v47  ;;  %p522_p4 = scmp.ne.s32.totalorder %s362_s1, %s521_s4  ;;  %p527_p6 = scmp.lt.s32.totalorder %s521_s4, %s521_s4 }
  0x70   :  { %p528_p7 = por %p527_p6, %p526_p5 }
  0x72   :  { %p529_p8 = pnand %p528_p7, %p522_p4 }
  0x74   :  { %395 = vmatpush1.bf16.xpose.msra.mxu0 %v394_v1  ;;  %420 = vmatpush1.bf16.xpose.msra.mxu1 %v394_v1 }
  0x75   :  { %397 = vmatprep.subr.bf16.mxu0 %v396_v4  ;;  %413 = vmatprep.subr.bf16.mxu1 %v396_v4 }
  0x7c   :  { %399 = vmatpush1.bf16.xpose.msra.mxu0 %v398_v23  ;;  %421 = vmatpush1.bf16.xpose.msra.mxu1 %v398_v23 }
  0x7d   :  { %401 = vmatprep.subr.bf16.mxu0 %v400_v26  ;;  %414 = vmatprep.subr.bf16.mxu1 %v400_v26 }
  0x84   :  { %403 = vmatpush1.bf16.xpose.msra.mxu0 %v402_v41  ;;  %422 = vmatpush1.bf16.xpose.msra.mxu1 %v402_v41 }
  0x85   :  { %405 = vmatprep.subr.bf16.mxu0 %v404_v44  ;;  %415 = vmatprep.subr.bf16.mxu1 %v404_v44 }
  0x8c   :  { %407 = vmatpush1.bf16.xpose.msra.mxu0 %v406_v49  ;;  %423 = vmatpush1.bf16.xpose.msra.mxu1 %v406_v49 }
  0x93   :  { %328 = vmatmul.mubr.f32.vlgmr.msra.gmra.mrb[0].mxu0 %v255_v50  ;;  %338 = vmatmul.mubr.f32.vlgmr.msra.gmra.mrb[0].mxu1 %v259_v51 }
  0x94   :  { %332 = vmatprep.mubr.f32.mxu0 %v258_v52  ;;  %342 = vmatprep.mubr.f32.mxu1 %v262_v53 }
  0x97   :  { %333 = vmatmul.mubr.f32.gmra.mrb[2].mxu0 %v257_v54  ;;  %343 = vmatmul.mubr.f32.gmra.mrb[2].mxu1 %v261_v55 }
 0x166   :  { %v329_v57 = vpop.f32.mrb[0].mxu0  ;;  %v339_v58 = vpop.f32.mrb[0].mxu1 }
 0x167   :  { %v348_v59 = vadd.f32 %v375_v56, %v329_v57  ;;  %v350_v60 = vadd.f32 %v375_v56, %v339_v58  ;;  %v331_v61 = vpop.f32.mrb[1].mxu0  ;;  %v341_v62 = vpop.f32.mrb[1].mxu1 }
 0x169   :  { %352 = vst [vmem:[#allocation10] sm:$0xff] %v348_v59  ;;  %354 = vst [vmem:[#allocation10 + $0x10] sm:$0xff] %v350_v60 }
 0x16a   :  { %v334_v63 = vpop.f32.mrb[2].mxu0  ;;  %v344_v0 = vpop.f32.mrb[2].mxu1 }
 0x16b   :  { %v349_v1 = vadd.f32 %v375_v56, %v334_v63  ;;  %v351_v2 = vadd.f32 %v375_v56, %v344_v0  ;;  %v336_v3 = vpop.f32.mrb[3].mxu0  ;;  %v346_v4 = vpop.f32.mrb[3].mxu1 }
 0x16d   :  { %353 = vst [vmem:[#allocation10 + $0x8] sm:$0xff] %v349_v1  ;;  %355 = vst [vmem:[#allocation10 + $0x18] sm:$0xff] %v351_v2 }
 0x16e   :  { %532 = shalt.err (!%p529_p8)
}
 0x16f   :  { %s533_s19 = scalar_lea.hbm %s684_s5, 512 }
 0x170   :  { %p534_p9 = scmp.ne.s32.totalorder %s684_s5, %s533_s19  ;;  %p537_p10 = scmp.lt.u32.totalorder %s533_s19, %s684_s5 }
 0x172   :  { %p539_p11 = pnand %p537_p10, %p534_p9 }
 0x174   :  { %542 = shalt.err (!%p539_p11)
}
 0x175   :  { %s558_s25 = smov 128   ;;  %s559_s26 = smov 8  }
 0x176   :  { %367 = dma.vmem_to_hbm [thread:$0]  %s362_s1, 512, %s684_s5, [#allocation4], %s558_s25, %s558_s25, %s559_s26  }
 0x177   :  { %549 = dma.done.wait [#allocation4], 512  }
 0x178   :  { %550 = vsyncadd [#allocation4], 4294966784 }
 0x179   :  { %371 = vsyncpa [#allocation3], 1 }
 0x17a   :  { %372 = vsyncpa [#allocation6], 1 }
 0x17b   :  { %373 = vsyncpa [#allocation9], 1 }
 0x17c   :  { %374 = vsyncpa [#allocation4], 1 }

</bundles_post_ra>
